<compile_context>
chip_gen: v5e
topology: v5e:2x2
jax: 0.10.0
libtpu: 0.0.40
codegen_flags: <defaults>
</compile_context>

<pallas_src>
import math

import jax
import jax.numpy as jnp
from jax.experimental import pallas as pl
from jax.experimental.pallas import tpu as pltpu


# ----------------------------------------------------------------------------
# Parameter setup (matches the PyTorch __init__)
# ----------------------------------------------------------------------------
def make_positional_encoding(d_model: int, max_seq_length: int) -> jnp.ndarray:
    """pe of shape (1, max_seq_length, d_model), float32, sin/cos interleaved."""
    position = jnp.arange(0, max_seq_length, dtype=jnp.float32)[:, None]        # (L, 1)
    div_term = jnp.exp(
        jnp.arange(0, d_model, 2, dtype=jnp.float32) * (-math.log(10000.0) / d_model)
    )                                                                            # (D/2,)
    pe = jnp.zeros((max_seq_length, d_model), dtype=jnp.float32)
    pe = pe.at[:, 0::2].set(jnp.sin(position * div_term))
    pe = pe.at[:, 1::2].set(jnp.cos(position * div_term))
    return pe[None, :, :]                                                        # (1, L, D)


def prepare_pe(pe: jnp.ndarray, seq_len: int, dtype) -> jnp.ndarray:
    """Hoistable pe prep: slice (1, L, D) -> (seq_len, D) and cast ONCE.

    Call this once outside the hot loop (optionally with dtype=bfloat16 to get
    an all-bf16 fast path) and pass the result to positional_encoding_forward.
    """
    return pe[0, :seq_len, :].astype(dtype)


# ----------------------------------------------------------------------------
# Kernel: broadcast add of the positional table over the batch rows
# ----------------------------------------------------------------------------
def _add_pe_kernel(x_ref, pe_ref, o_ref):
    # pe_ref has a broadcastable leading shape vs x_ref; the add happens in the
    # promoted dtype and is stored in the output dtype (PyTorch promotion).
    o_ref[...] = (x_ref[...] + pe_ref[...]).astype(o_ref.dtype)


# ----------------------------------------------------------------------------
# Tiling helpers
# ----------------------------------------------------------------------------
def _default_block_budget_bytes() -> int:
    # Double-buffered blocks must fit the *scoped* VMEM default (v5e 16 MiB,
    # v6e/v7x 32 MiB; v7x has only 64 MiB physical per TC). 8 MiB of block
    # working set is safe on every generation and >=512-lane tiles already run
    # at ~85% of the HBM roofline, so a larger budget buys nothing measurable.
    try:
        cap = pltpu.get_tpu_info().vmem_capacity_bytes
    except Exception:  # interpret mode / older jax: be conservative
        cap = 64 * 1024 * 1024
    return min(8 * 1024 * 1024, max(1 << 20, cap // 8))


def _round_up(x: int, m: int) -> int:
    return ((x + m - 1) // m) * m


def _choose_tile(total: int, unit: int, max_tile: int, *,
                 min_steps: int = 4, prefer_even: bool = True) -> int:
    """Pick a tile (multiple of `unit`, or the full extent) for a streamed axis.

    Enforces a floor on the number of grid steps (pipelining and megacore
    sharding need multiple steps to overlap anything) and prefers an even step
    count so the two TensorCores on v7x get balanced halves.
    """
    if total <= unit:
        return total                                   # full-extent block
    max_tile = max(unit, (max_tile // unit) * unit)
    base_steps = max(min_steps, pl.cdiv(total, max_tile), 1)
    best = None
    for steps in range(base_steps, base_steps + 4):
        tile = min(max_tile, _round_up(pl.cdiv(total, steps), unit))
        if tile >= total:
            tile = total
        n = pl.cdiv(total, tile)
        if best is None:
            best = tile
        if (not prefer_even) or (n % 2 == 0) or n == 1:
            return tile
    return best


# ----------------------------------------------------------------------------
# Forward wrapper
# ----------------------------------------------------------------------------
def positional_encoding_forward(
    x: jnp.ndarray,
    pe: jnp.ndarray,
    *,
    block_budget_bytes: int | None = None,
    donate_x: bool = False,
) -> jnp.ndarray:
    """out = x + pe[:, :T]   (PositionalEncoding.forward).

    x:  (B, T, d_model).
    pe: raw (1, max_seq_length, d_model) table, or an already-prepared
        (T, d_model) slice from `prepare_pe` (preferred inside hot loops).
    """
    B, T, D = x.shape
    if block_budget_bytes is None:
        block_budget_bytes = _default_block_budget_bytes()

    # PyTorch type promotion: bf16/f16 x + f32 pe -> f32 output.
    out_dtype = jnp.promote_types(x.dtype, pe.dtype)
    if pe.ndim == 3:
        pe_t = prepare_pe(pe, T, out_dtype)            # per-call fallback path
    else:
        pe_t = pe
        if pe_t.shape[0] != T:
            pe_t = pe_t[:T]
        if pe_t.dtype != out_dtype:
            pe_t = pe_t.astype(out_dtype)
    assert pe_t.shape == (T, D)

    db_x = jnp.dtype(x.dtype).itemsize
    db_o = jnp.dtype(out_dtype).itemsize
    db_pe = jnp.dtype(pe_t.dtype).itemsize

    cost = pl.CostEstimate(
        flops=B * T * D,
        transcendentals=0,
        bytes_accessed=B * T * D * (db_x + db_o) + T * D * db_pe,
    )
    io_alias = {0: 0} if (donate_x and out_dtype == x.dtype) else {}

    # ------------- Path A: row-tiled (B, T, D), sublane-dense ---------------
    if D % 128 == 0 and T >= 8:
        per_row_bytes = 2 * D * (db_x + db_o + db_pe)          # double-buffered
        tr_max = (block_budget_bytes // per_row_bytes) // 8 * 8
        if tr_max >= 8:
            tr = _choose_tile(
                T, 8, tr_max,
                min_steps=max(1, pl.cdiv(4, B)),               # >= ~4 total steps
                prefer_even=(B % 2 == 1),
            )
            n_t = pl.cdiv(T, tr)
            return pl.pallas_call(
                _add_pe_kernel,
                out_shape=jax.ShapeDtypeStruct((B, T, D), out_dtype),
                grid_spec=pltpu.PrefetchScalarGridSpec(
                    num_scalar_prefetch=0,
                    grid=(n_t, B),                    # b innermost -> pe tile reused
                    in_specs=[
                        pl.BlockSpec((1, tr, D), lambda t, b: (b, t, 0)),
                        pl.BlockSpec((tr, D), lambda t, b: (t, 0)),
                    ],
                    out_specs=pl.BlockSpec((1, tr, D), lambda t, b: (b, t, 0)),
                ),
                compiler_params=pltpu.CompilerParams(
                    dimension_semantics=("parallel", "parallel"),
                ),
                cost_estimate=cost,
                input_output_aliases=io_alias,
            )(x, pe_t)

    # ------------- Path B: lane-dense flatten (B, T*D) ----------------------
    F = T * D
    x_flat = x.reshape(B, F)
    pe_flat = pe_t.reshape(1, F)

    per_elem = 2 * (db_x + db_o)                       # double-buffered in + out
    b_tile = B
    if B > 8 and (B * per_elem + 2 * db_pe) * 128 > block_budget_bytes:
        # Very large batch: tile the sublane axis too (multiples of 8).
        b_tile = max(8, (block_budget_bytes // (128 * per_elem)) // 8 * 8)
    n_b = pl.cdiv(B, b_tile)

    max_lanes = block_budget_bytes // (b_tile * per_elem + 2 * db_pe)
    lane_tile = _choose_tile(
        F, 128, max_lanes,
        min_steps=max(1, pl.cdiv(4, n_b)),
        prefer_even=(n_b % 2 == 1),
    )
    n_f = pl.cdiv(F, lane_tile)

    out_flat = pl.pallas_call(
        _add_pe_kernel,
        out_shape=jax.ShapeDtypeStruct((B, F), out_dtype),
        grid_spec=pltpu.PrefetchScalarGridSpec(
            num_scalar_prefetch=0,
            grid=(n_f, n_b),                           # b innermost -> pe tile reused
            in_specs=[
                pl.BlockSpec((b_tile, lane_tile), lambda f, b: (b, f)),
                pl.BlockSpec((1, lane_tile), lambda f, b: (0, f)),
            ],
            out_specs=pl.BlockSpec((b_tile, lane_tile), lambda f, b: (b, f)),
        ),
        compiler_params=pltpu.CompilerParams(
            dimension_semantics=("parallel", "parallel"),
        ),
        cost_estimate=cost,
        input_output_aliases=io_alias,
    )(x_flat, pe_flat)
    return out_flat.reshape(B, T, D)


if __name__ == "__main__":
    key = jax.random.PRNGKey(0)
    k0, k1, k2 = jax.random.split(key, 3)

    # --- Path B (lane-dense flatten): d_model < 128 -------------------------
    B, T, d_model, L = 2, 8, 32, 16
    pe = make_positional_encoding(d_model, L)
    x = jax.random.normal(k0, (B, T, d_model), dtype=jnp.float32)
    out = jax.block_until_ready(positional_encoding_forward(x, pe))
    ref = x + pe[:, :T]
    assert out.shape == (B, T, d_model) and out.dtype == ref.dtype
    assert jnp.allclose(out, ref, atol=1e-6), "flatten-path mismatch vs reference"

    # bf16 activations + f32 table (PyTorch promotion -> f32 output), with the
    # pe prep hoisted via prepare_pe.
    xb = jax.random.normal(k1, (B, T, d_model), dtype=jnp.bfloat16)
    pe_ready = prepare_pe(pe, T, jnp.float32)
    outb = jax.block_until_ready(positional_encoding_forward(xb, pe_ready))
    refb = xb.astype(jnp.float32) + pe[:, :T]
    assert outb.dtype == jnp.float32
    assert jnp.allclose(outb, refb, atol=1e-6), "bf16-path mismatch vs reference"

    # --- Path A (row-tiled, sublane-dense): d_model multiple of 128 ---------
    B2, T2, D2, L2 = 2, 16, 128, 32
    pe2 = make_positional_encoding(D2, L2)
    x2 = jax.random.normal(k2, (B2, T2, D2), dtype=jnp.float32)
    ref2 = x2 + pe2[:, :T2]                            # computed before donation
    out2 = jax.block_until_ready(
        positional_encoding_forward(x2, pe2, donate_x=True)  # x2 unused afterwards
    )
    assert out2.shape == (B2, T2, D2)
    assert jnp.allclose(out2, ref2, atol=1e-6), "row-path mismatch vs reference"

    print("KERNEL_OK")
</pallas_src>

<mosaic_0001>
module attributes {stable_mosaic.version = 11 : i64} {
  func.func @_add_pe_kernel(%arg0: i32, %arg1: i32, %arg2: memref<2x128xf32, #tpu.memory_space<vmem>>, %arg3: memref<1x128xf32, #tpu.memory_space<vmem>>, %arg4: memref<2x128xf32, #tpu.memory_space<vmem>>) attributes {dimension_semantics = [#tpu.dimension_semantics<parallel>, #tpu.dimension_semantics<parallel>], iteration_bounds = array<i64: 2, 1>, scalar_prefetch = 0 : i64, scratch_operands = 0 : i64, tpu.core_type = #tpu.core_type<tc>, window_params = [{transform_indices = @transform_0, window_bounds = array<i64: 2, 128>}, {transform_indices = @transform_1, window_bounds = array<i64: 1, 128>}, {transform_indices = @transform_2, window_bounds = array<i64: 2, 128>}]} {
    %c0 = arith.constant 0 : index
    %c0_0 = arith.constant 0 : index
    %0 = vector.load %arg2[%c0, %c0_0] : memref<2x128xf32, #tpu.memory_space<vmem>>, vector<2x128xf32>
    %c0_1 = arith.constant 0 : index
    %c0_2 = arith.constant 0 : index
    %1 = vector.load %arg3[%c0_1, %c0_2] : memref<1x128xf32, #tpu.memory_space<vmem>>, vector<1x128xf32>
    %2 = vector.broadcast %1 : vector<1x128xf32> to vector<2x128xf32>
    %3 = arith.addf %0, %2 : vector<2x128xf32>
    %c0_3 = arith.constant 0 : index
    %c0_4 = arith.constant 0 : index
    %4 = vector.load %arg4[%c0_3, %c0_4] : memref<2x128xf32, #tpu.memory_space<vmem>>, vector<2x128xf32>
    tpu.vector_store %arg4[%c0_3, %c0_4], %3 {strides = array<i32>} : memref<2x128xf32, #tpu.memory_space<vmem>>, vector<2x128xf32>,
    return
  }
  func.func @transform_0(%arg0: i32, %arg1: i32) -> (i32, i32) {
    %c0_i32 = arith.constant 0 : i32
    return %arg1, %arg0 : i32, i32
  }
  func.func @transform_1(%arg0: i32, %arg1: i32) -> (i32, i32) {
    %c0_i32 = arith.constant 0 : i32
    %c0_i32_0 = arith.constant 0 : i32
    return %c0_i32, %arg0 : i32, i32
  }
  func.func @transform_2(%arg0: i32, %arg1: i32) -> (i32, i32) {
    %c0_i32 = arith.constant 0 : i32
    return %arg1, %arg0 : i32, i32
  }
}

</mosaic_0001>

<bundles_post_ra>
// kernel: tpu_custom_call.1
= control target key start
LH: loop header
LB: loop body
LE: loop exit
PB: predicated region body
PF: predicated region fallthrough
CT: control target
= control target key end

     0   :  { %7 = vsyncpa [#allocation3], 0  ;;  %s714_s0 = inlined_call_operand.hbm [shape: f32[2,256], index: 0, kind: input, shape index: {}]   ;;  %s715_s1 = inlined_call_operand.hbm [shape: f32[1,256], index: 1, kind: input, shape index: {}]   ;;  %s716_s2 = inlined_call_operand.hbm [shape: f32[2,256], index: 2, kind: output, shape index: {}]  }
   0x1   :  { %9 = vsyncpa [#allocation3 + $0x1], 0 }
   0x2   :  { %10 = vsyncpa [#allocation6], 0 }
   0x3   :  { %12 = vsyncpa [#allocation6 + $0x1], 0 }
   0x4   :  { %13 = vsyncpa [#allocation4], 0 }
   0x5   :  { %15 = vsyncpa [#allocation4 + $0x1], 0  ;;  %s584_s9 = smov 0   ;;  %s586_s10 = smov 0  }
   0x6   :  { %s588_s11 = smov 0   ;;  %s590_s12 = smov 0  }
   0x7   :  { %s592_s13 = smov 0   ;;  %s594_s14 = smov 0  }
   0x8 LB: > { %s340_s15 = sadd.s32 4294967295, %s567_s14   ;;  %s341_s16 = sadd.s32 4294967294, %s567_s14   ;;  %s567_s14 = sphi %s594_s14, %s21_s14   ;;  %s563_s13 = sphi %s592_s13, %s725_s13   ;;  %s559_s12 = sphi %s590_s12, %s724_s12   ;;  %s555_s11 = sphi %s588_s11, %s723_s11   ;;  %s551_s10 = sphi %s586_s10, %s722_s10   ;;  %s547_s9 = sphi %s584_s9, %s721_s9  }
   0x9   : > { %s33_s17 = sadd.s32 1, %s563_s13  ;;  %s42_s18 = sadd.s32 1, %s555_s11 }
   0xa   : > { %p35_p0 = scmp.ge.s32.totalorder %s33_s17, 2  ;;  %p49_p1 = scmp.ne.s32.totalorder %s555_s11, %s551_s10 }
   0xb   : > { %p50_p2 = scmp.eq.s32.totalorder %s567_s14, 0  ;;  %p55_p3 = scmp.ne.s32.totalorder %s551_s10, %s547_s9 }
   0xc   : > { %s727_s17 = smov (%p35_p0, %s33_s17), 0  ;;  %p56_p5 = scmp.eq.s32.totalorder %s340_s15, 0 }
   0xd   : > { %p625_p4 = por %p50_p2, %p49_p1  ;;  %s38_s20 = ssub.s32 %s563_s13, %s727_s17 }
   0xe   : > { %p107_p6 = scmp.eq.s32.totalorder %s340_s15, 1  ;;  %p40_p7 = scmp.eq.s32.totalorder %s38_s20, 0 }
   0xf   : > { %p631_p8 = por %p56_p5, %p55_p3  ;;  %p113_p10 = scmp.eq.s32.totalorder %s341_s16, 1 }
  0x10   : > { %p635_p9 = por %p107_p6, %p49_p1  ;;  %p343_p12 = scmp.ge.s32.totalorder %s567_s14, 2 }
  0x11   : > { %s640_s23 = scalar_select %p40_p7, %s555_s11, %s42_s18  }
  0x12   : > { %p642_p11 = por %p113_p10, %p55_p3  ;;  %p370_p13 = scmp.lt.s32.totalorder %s567_s14, 2 }
  0x13   : > { %s133_s25 = sand.u32 1, %s555_s11   ;;  %s345_s27 = sshll.u32 %s563_s13, 1 }
  0x14   : > { %s344_s26 = sshll.u32 %s133_s25, 1  ;;  %s143_s30 = scalar_lea.hbm %s714_s0, %s345_s27 }
  0x15   : > { %s137_s3 = scalar_lea.vmem [#allocation2], %s344_s26  ;;  %s145_s5 = sshll.u32 %s143_s30, 4  ;;  %s146_s5 = int_to_ptr.hbm [resolvable:$true] %s145_s5 }
  0x16   : > { %s147_s4 = sshll.u32 %s137_s3, 4  ;;  %p360_p0 = pnand %p370_p13, %p625_p4  ;;  %s148_s4 = int_to_ptr.vmem [resolvable:$true] %s147_s4 }
  0x17   : > { %p346_p1 = scmp.ge.s32.totalorder %s567_s14, 1  ;;  %p169_p2 = scmp.lt.s32.totalorder %s567_s14, 3 }
  0x18   : > { %s134_s6 = scalar_lea.sflag [#allocation3], %s133_s25  ;;  %s160_s15 = scalar_lea.hbm %s715_s1, %s563_s13 }
  0x19   : > { %362 = dma.hbm_to_vmem [thread:$0]  (!%p360_p0), %s146_s5, 32, %s148_s4, %s134_s6  }
  0x1a   : > { %p170_p3 = pnand %p346_p1, %p169_p2  ;;  %s157_s16 = scalar_lea.vmem [#allocation5], %s133_s25 }
  0x1b   : > { %s164_s18 = sshll.u32 %s157_s16, 4  ;;  %s162_s20 = sshll.u32 %s160_s15, 4  ;;  %s165_s18 = int_to_ptr.vmem [resolvable:$true] %s164_s18  ;;  %s163_s20 = int_to_ptr.hbm [resolvable:$true] %s162_s20 }
  0x1c   : > { %s155_s26 = scalar_lea.sflag [#allocation6], %s133_s25  ;;  %173 = sbr.rel (%p170_p3) target bundleno = 51 (0x33), region = 28 }
  0x1d   : > { %365 = dma.hbm_to_vmem [thread:$0]  (!%p360_p0), %s163_s20, 16, %s165_s18, %s155_s26  }
  0x1e   : > { %s662_s19 = sand.u32 (!%p170_p3), 1, %s551_s10  }
  0x1f   : > { %s347_s27 = sshll.u32 (!%p170_p3), %s662_s19, 1  ;;  %s176_s28 = scalar_lea.sflag (!%p170_p3), [#allocation3], %s662_s19 }
  0x20   : > { %s179_s29 = scalar_lea.vmem (!%p170_p3), [#allocation2], %s347_s27 }
  0x21   : > { %534 = dma.done.wait (%p631_p8), %s176_s28, 32  }
  0x22   : > { %536 = vsyncadd (%p631_p8), %s176_s28, 4294967264  ;;  %s186_s25 = scalar_lea.sflag [#allocation6], %s662_s19  ;;  %s188_s30 = scalar_lea.vmem [#allocation5], %s662_s19 }
  0x23   : > { %538 = dma.done.wait (%p631_p8), %s186_s25, 16  }
  0x24   : > { %540 = vsyncadd (%p631_p8), %s186_s25, 4294967280  ;;  %s350_s3 = sshll.u32 %s559_s12, 1  ;;  %s213_s7 = scalar_lea.vmem [#allocation7], %s347_s27  ;;  %v214_v0 = vld [vmem:[%s179_s29] sm:$0x3] }
  0x25   : > { %s234_s6 = scalar_lea.hbm %s716_s2, %s350_s3  ;;  %s236_s8 = sshll.u32 %s213_s7, 4  ;;  %v420_v1 = vld [vmem:[%s188_s30] ss:$0 sm:$0xff]  ;;  %s237_s8 = int_to_ptr.vmem [resolvable:$true] %s236_s8 }
  0x26   : > { %s238_s15 = sshll.u32 %s234_s6, 4  ;;  %v219_v2 = vadd.f32 %v420_v1, %v214_v0  ;;  %s222_s16 = scalar_lea.sflag [#allocation4], %s662_s19  ;;  %s239_s15 = int_to_ptr.hbm [resolvable:$true] %s238_s15 }
  0x27   : > { %s495_s21 = sshra.s32 %s239_s15, 4  ;;  %s501_s26 = scalar_lea.hbm %s716_s2, 4  ;;  %s496_s21 = int_to_ptr.hbm [resolvable:$true] %s495_s21 }
  0x28   : > { %220 = vst [vmem:[%s213_s7] sm:$0x3] %v219_v2  ;;  %s497_s18 = scalar_lea.hbm %s496_s21, 2  ;;  %p502_p7 = scmp.lt.s32.totalorder %s496_s21, %s716_s2 }
  0x29   : > { %p498_p4 = scmp.ne.s32.totalorder %s496_s21, %s497_s18  ;;  %p503_p8 = scmp.lt.s32.totalorder %s501_s26, %s497_s18 }
  0x2b   : > { %p499_p5 = pnand %p498_p4, %p635_p9  ;;  %p504_p10 = por %p503_p8, %p502_p7 }
  0x2d   : > { %p500_p6 = pneg %p499_p5 }
  0x2f   : > { %p505_p13 = pnand %p504_p10, %p500_p6 }
  0x31   : > { %508 = shalt.err (!%p505_p13)
}
  0x32   : > { %357 = dma.vmem_to_hbm [thread:$0]  (%p635_p9), %s237_s8, 32, %s239_s15, %s222_s16  }
  0x33 PF: > { %s250_s19 = sand.u32 1, %s547_s9   ;;  %p367_p0 = pnand %p343_p12, %p642_p11 }
  0x34   : > { %s251_s29 = scalar_lea.sflag [#allocation4], %s250_s19 }
  0x35   : > { %p368_p1 = pneg %p367_p0 }
  0x37   : > { %542 = dma.done.wait (%p368_p1), %s251_s29, 32  }
  0x38   : > { %544 = vsyncadd (%p368_p1), %s251_s29, 4294967264  ;;  %s21_s14 = sadd.s32 1, %s567_s14   ;;  %s721_s9 = smov %s551_s10 }
  0x39   : > { %p18_p2 = scmp.ge.s32.totalorder %s21_s14, 4   ;;  %s722_s10 = smov %s555_s11 }
  0x3a   : > { %s723_s11 = smov %s640_s23  ;;  %s724_s12 = smov %s563_s13 }
  0x3b   : > { %s725_s13 = smov %s727_s17  ;;  %20 = sbr.rel (!%p18_p2) target bundleno = 8 (0x8), region = 86 }
  0x40   :  { %257 = vsyncpa [#allocation3], 1 }
  0x41   :  { %259 = vsyncpa [#allocation3 + $0x1], 1 }
  0x42   :  { %260 = vsyncpa [#allocation6], 1 }
  0x43   :  { %262 = vsyncpa [#allocation6 + $0x1], 1 }
  0x44   :  { %263 = vsyncpa [#allocation4], 1 }
  0x45   :  { %265 = vsyncpa [#allocation4 + $0x1], 1 }

</bundles_post_ra>
